<compile_context>
chip_gen: v7x
topology: tpu7x:2x2x1
jax: 0.10.0
libtpu: 0.0.40
codegen_flags: <defaults>
</compile_context>

<pallas_src>
import functools

import jax
import jax.numpy as jnp
from jax.experimental import pallas as pl
from jax.experimental.pallas import tpu as pltpu

_TAPS = tuple((dy, dx) for dy in (-1, 0, 1) for dx in (-1, 0, 1))


def _residual_block_kernel(mask_ref, x_ref, w_ref, o_ref, *, H, W):
    """One grid step = NT images folded onto the sublane axis (R = NT*C rows).

    mask_ref: (9*R, HW)  border masks, pre-broadcast, constant across steps
    x_ref   : (1, R, HW) input tile (HW on lanes -> lane-dense loads/stores)
    w_ref   : (2, R, 9R) NT-block-diagonal packed conv weights
    o_ref   : (1, R, HW) output tile
    """
    HW = H * W
    eps = 1e-5

    def conv3x3(x2, wblk):
        # 9 lane rolls (XLU slot) -> in-vreg concat -> one masked multiply ->
        # ONE MXU matmul.  No VMEM scratch round trip.
        tiles = []
        for dy, dx in _TAPS:
            d = dy * W + dx                      # flat-index source shift
            tiles.append(x2 if d == 0 else pltpu.roll(x2, (-d) % HW, axis=1))
        stack = jnp.concatenate(tiles, axis=0) * mask_ref[...]       # (9R, HW)
        return jnp.dot(wblk, stack, preferred_element_type=jnp.float32)  # (R, HW)

    def instance_norm(y):
        # Each row is one (image, channel): a plain lane reduction is exactly
        # InstanceNorm2d.  Centered two-pass variance kept for numerical safety
        # (fused E[x^2]-mu^2 would halve XLU reductions; optional).
        mu = jnp.sum(y, axis=1, keepdims=True) * (1.0 / HW)
        c = y - mu
        var = jnp.sum(c * c, axis=1, keepdims=True) * (1.0 / HW)
        return c * jax.lax.rsqrt(var + eps)      # rsqrt -> EUP slot

    x = x_ref[0].astype(jnp.float32)             # (R, HW), lane-dense
    h = conv3x3(x, w_ref[0])                     # conv1
    h = jnp.maximum(instance_norm(h), 0.0)       # IN + ReLU
    h = conv3x3(h, w_ref[1])                     # conv2
    h = instance_norm(h)                         # IN
    o_ref[0] = (x + h).astype(o_ref.dtype)       # residual, lane-dense store


@functools.partial(jax.jit, static_argnames=("images_per_step",))
def bloque_residual(x_nchw, w1_oihw, w2_oihw, images_per_step=None):
    """x_nchw: (N, C, H, W) f32; w*_oihw: (C, C, 3, 3) f32 (PyTorch layouts)."""
    N, C, H, W = x_nchw.shape
    HW = H * W

    # Images folded per grid step (sublane axis).  Default keeps >= 2 parallel
    # steps for v7x's two TensorCores; on v5e/v6e pass images_per_step=N.
    NT = images_per_step if images_per_step is not None else max(1, N // 2)
    if N % NT != 0:
        NT = 1
    S = N // NT
    R = NT * C

    # (N, C, H, W) -> (S, NT*C, H*W): pure contiguous reshape, no transpose.
    x_folded = x_nchw.reshape(S, R, HW)

    # Pack conv weights (O, I, 3, 3) -> (C, 9, C) with column order k*C + ci
    # (k = 3*(dy+1)+(dx+1)), then expand to an NT-block-diagonal (R, 9R) slab so
    # ONE matmul covers all NT folded images.  Both convs ship as one (2, R, 9R)
    # input -> a single small weight DMA reused across all grid steps.
    eye = jnp.eye(NT, dtype=x_nchw.dtype)

    def pack(w):
        wp = jnp.transpose(w, (0, 2, 3, 1)).reshape(C, 9, C)      # [co, k, ci]
        return jnp.einsum("nm,oki->nokmi", eye, wp).reshape(R, 9 * R)

    w_all = jnp.stack([pack(w1_oihw), pack(w2_oihw)], axis=0)     # (2, R, 9R)

    # Border masks for the 9 taps, hoisted out of the kernel and pre-broadcast
    # to the full stack shape (9R, HW); constant index_map -> fetched once.
    pos = jnp.arange(HW, dtype=jnp.int32)
    row, col = pos // W, pos % W
    mask_rows = []
    for dy, dx in _TAPS:
        valid = ((row + dy >= 0) & (row + dy < H) &
                 (col + dx >= 0) & (col + dx < W)).astype(x_nchw.dtype)
        mask_rows.append(jnp.broadcast_to(valid[None, :], (R, HW)))
    mask_all = jnp.concatenate(mask_rows, axis=0)                 # (9R, HW)

    out_folded = pl.pallas_call(
        functools.partial(_residual_block_kernel, H=H, W=W),
        out_shape=jax.ShapeDtypeStruct((S, R, HW), x_nchw.dtype),
        grid_spec=pltpu.PrefetchScalarGridSpec(
            num_scalar_prefetch=0,
            grid=(S,),
            in_specs=[
                pl.BlockSpec((9 * R, HW), lambda s: (0, 0)),
                pl.BlockSpec((1, R, HW), lambda s: (s, 0, 0)),
                pl.BlockSpec((2, R, 9 * R), lambda s: (0, 0, 0)),
            ],
            out_specs=pl.BlockSpec((1, R, HW), lambda s: (s, 0, 0)),
        ),
        compiler_params=pltpu.CompilerParams(
            dimension_semantics=("parallel",)),
    )(mask_all, x_folded, w_all)

    return out_folded.reshape(N, C, H, W)


def _reference(x_nchw, w1, w2):
    """Plain-JAX reference mirroring the PyTorch module (NCHW)."""
    def conv(x, w):
        return jax.lax.conv_general_dilated(
            x, w, window_strides=(1, 1), padding=((1, 1), (1, 1)),
            dimension_numbers=("NCHW", "OIHW", "NCHW"),
            precision=jax.lax.Precision.HIGHEST)

    def inorm(x):
        mu = x.mean(axis=(2, 3), keepdims=True)
        var = ((x - mu) ** 2).mean(axis=(2, 3), keepdims=True)
        return (x - mu) / jnp.sqrt(var + 1e-5)

    h = jax.nn.relu(inorm(conv(x_nchw, w1)))
    h = inorm(conv(h, w2))
    return x_nchw + h


if __name__ == "__main__":
    C, H, W = 4, 16, 16

    key = jax.random.PRNGKey(0)
    kx, k1, k2 = jax.random.split(key, 3)
    # Deterministic synthetic weights (Conv2d(C, C, 3, 3), bias=False).
    w1 = 0.1 * jax.random.normal(k1, (C, C, 3, 3), dtype=jnp.float32)
    w2 = 0.1 * jax.random.normal(k2, (C, C, 3, 3), dtype=jnp.float32)

    # Spec shape: batch=2 -> default NT=1, two parallel grid steps (v7x-friendly).
    x2 = jax.random.normal(kx, (2, C, H, W), dtype=jnp.float32)
    out2 = jax.block_until_ready(bloque_residual(x2, w1, w2))
    ref2 = jax.block_until_ready(_reference(x2, w1, w2))
    assert out2.shape == (2, C, H, W)
    assert jnp.allclose(out2, ref2, atol=5e-3, rtol=5e-3), (
        float(jnp.max(jnp.abs(out2 - ref2))))

    # Exercise the batch-folding path: batch=4 -> NT=2 images per step, 2 steps
    # (full 8-sublane vregs, block-diagonal weights, cross-image roll masking).
    x4 = jax.random.normal(kx, (4, C, H, W), dtype=jnp.float32)
    out4 = jax.block_until_ready(bloque_residual(x4, w1, w2))
    ref4 = jax.block_until_ready(_reference(x4, w1, w2))
    assert out4.shape == (4, C, H, W)
    assert jnp.allclose(out4, ref4, atol=5e-3, rtol=5e-3), (
        float(jnp.max(jnp.abs(out4 - ref4))))

    print("KERNEL_OK")
</pallas_src>

<mosaic_0001>
module attributes {stable_mosaic.version = 11 : i64} {
  func.func @_residual_block_kernel(%arg0: i32, %arg1: memref<36x256xf32, #tpu.memory_space<vmem>>, %arg2: memref<1x4x256xf32, #tpu.memory_space<vmem>>, %arg3: memref<2x4x36xf32, #tpu.memory_space<vmem>>, %arg4: memref<1x4x256xf32, #tpu.memory_space<vmem>>) attributes {dimension_semantics = [#tpu.dimension_semantics<parallel>], iteration_bounds = array<i64: 2>, scalar_prefetch = 0 : i64, scratch_operands = 0 : i64, tpu.core_type = #tpu.core_type<tc>, window_params = [{pipeline_mode = #tpu.pipeline_mode<synchronous>, transform_indices = @transform_0, window_bounds = array<i64: 36, 256>}, {transform_indices = @transform_1, window_bounds = array<i64: 1, 4, 256>}, {pipeline_mode = #tpu.pipeline_mode<synchronous>, transform_indices = @transform_2, window_bounds = array<i64: 2, 4, 36>}, {transform_indices = @transform_3, window_bounds = array<i64: 1, 4, 256>}]} {
    %c0 = arith.constant 0 : index
    %c0_0 = arith.constant 0 : index
    %c0_1 = arith.constant 0 : index
    %0 = vector.load %arg2[%c0, %c0_0, %c0_1] : memref<1x4x256xf32, #tpu.memory_space<vmem>>, vector<1x4x256xf32>
    %1 = vector.shape_cast %0 : vector<1x4x256xf32> to vector<4x256xf32>
    %c0_2 = arith.constant 0 : index
    %c0_3 = arith.constant 0 : index
    %c0_4 = arith.constant 0 : index
    %2 = vector.load %arg3[%c0_2, %c0_3, %c0_4] : memref<2x4x36xf32, #tpu.memory_space<vmem>>, vector<1x4x36xf32>
    %3 = vector.shape_cast %2 : vector<1x4x36xf32> to vector<4x36xf32>
    %c17_i32 = arith.constant 17 : i32
    %4 = tpu.dynamic_rotate %1 by %c17_i32 dim 1 : vector<4x256xf32>, i32 -> vector<4x256xf32>
    %c16_i32 = arith.constant 16 : i32
    %5 = tpu.dynamic_rotate %1 by %c16_i32 dim 1 : vector<4x256xf32>, i32 -> vector<4x256xf32>
    %c15_i32 = arith.constant 15 : i32
    %6 = tpu.dynamic_rotate %1 by %c15_i32 dim 1 : vector<4x256xf32>, i32 -> vector<4x256xf32>
    %c1_i32 = arith.constant 1 : i32
    %7 = tpu.dynamic_rotate %1 by %c1_i32 dim 1 : vector<4x256xf32>, i32 -> vector<4x256xf32>
    %c255_i32 = arith.constant 255 : i32
    %8 = tpu.dynamic_rotate %1 by %c255_i32 dim 1 : vector<4x256xf32>, i32 -> vector<4x256xf32>
    %c241_i32 = arith.constant 241 : i32
    %9 = tpu.dynamic_rotate %1 by %c241_i32 dim 1 : vector<4x256xf32>, i32 -> vector<4x256xf32>
    %c240_i32 = arith.constant 240 : i32
    %10 = tpu.dynamic_rotate %1 by %c240_i32 dim 1 : vector<4x256xf32>, i32 -> vector<4x256xf32>
    %c239_i32 = arith.constant 239 : i32
    %11 = tpu.dynamic_rotate %1 by %c239_i32 dim 1 : vector<4x256xf32>, i32 -> vector<4x256xf32>
    %12 = tpu.concatenate %4, %5, %6, %7, %1, %8, %9, %10, %11 in 0 : vector<4x256xf32>, vector<4x256xf32>, vector<4x256xf32>, vector<4x256xf32>, vector<4x256xf32>, vector<4x256xf32>, vector<4x256xf32>, vector<4x256xf32>, vector<4x256xf32> -> vector<36x256xf32>
    %c0_5 = arith.constant 0 : index
    %c0_6 = arith.constant 0 : index
    %13 = vector.load %arg1[%c0_5, %c0_6] : memref<36x256xf32, #tpu.memory_space<vmem>>, vector<36x256xf32>
    %14 = arith.mulf %12, %13 : vector<36x256xf32>
    %cst = arith.constant dense<0.000000e+00> : vector<4x256xf32>
    %15 = tpu.matmul %3, %14, %cst {dimension_numbers = #tpu.dot_dimension_numbers<[1], [0], [0], [1], [0, 0, 1, 1], [], []>} : vector<4x36xf32>, vector<36x256xf32>, vector<4x256xf32> -> vector<4x256xf32>
    %cst_7 = arith.constant dense<0.000000e+00> : vector<4xf32>
    %16 = vector.multi_reduction <add>, %15, %cst_7 [1] : vector<4x256xf32> to vector<4xf32>
    %17 = vector.shape_cast %16 : vector<4xf32> to vector<4x1xf32>
    %cst_8 = arith.constant 3.906250e-03 : f32
    %18 = vector.broadcast %cst_8 : f32 to vector<4x1xf32>
    %19 = arith.mulf %17, %18 : vector<4x1xf32>
    %20 = vector.broadcast %19 : vector<4x1xf32> to vector<4x256xf32>
    %21 = arith.subf %15, %20 : vector<4x256xf32>
    %22 = arith.mulf %21, %21 : vector<4x256xf32>
    %cst_9 = arith.constant dense<0.000000e+00> : vector<4xf32>
    %23 = vector.multi_reduction <add>, %22, %cst_9 [1] : vector<4x256xf32> to vector<4xf32>
    %24 = vector.shape_cast %23 : vector<4xf32> to vector<4x1xf32>
    %cst_10 = arith.constant 3.906250e-03 : f32
    %25 = vector.broadcast %cst_10 : f32 to vector<4x1xf32>
    %26 = arith.mulf %24, %25 : vector<4x1xf32>
    %cst_11 = arith.constant 9.99999974E-6 : f32
    %27 = vector.broadcast %cst_11 : f32 to vector<4x1xf32>
    %28 = arith.addf %26, %27 : vector<4x1xf32>
    %29 = math.rsqrt %28 : vector<4x1xf32>
    %30 = vector.broadcast %29 : vector<4x1xf32> to vector<4x256xf32>
    %31 = arith.mulf %21, %30 : vector<4x256xf32>
    %cst_12 = arith.constant 0.000000e+00 : f32
    %32 = vector.broadcast %cst_12 : f32 to vector<4x256xf32>
    %33 = arith.maximumf %31, %32 : vector<4x256xf32>
    %c1 = arith.constant 1 : index
    %c0_13 = arith.constant 0 : index
    %c0_14 = arith.constant 0 : index
    %34 = vector.load %arg3[%c1, %c0_13, %c0_14] : memref<2x4x36xf32, #tpu.memory_space<vmem>>, vector<1x4x36xf32>
    %35 = vector.shape_cast %34 : vector<1x4x36xf32> to vector<4x36xf32>
    %c17_i32_15 = arith.constant 17 : i32
    %36 = tpu.dynamic_rotate %33 by %c17_i32_15 dim 1 : vector<4x256xf32>, i32 -> vector<4x256xf32>
    %c16_i32_16 = arith.constant 16 : i32
    %37 = tpu.dynamic_rotate %33 by %c16_i32_16 dim 1 : vector<4x256xf32>, i32 -> vector<4x256xf32>
    %c15_i32_17 = arith.constant 15 : i32
    %38 = tpu.dynamic_rotate %33 by %c15_i32_17 dim 1 : vector<4x256xf32>, i32 -> vector<4x256xf32>
    %c1_i32_18 = arith.constant 1 : i32
    %39 = tpu.dynamic_rotate %33 by %c1_i32_18 dim 1 : vector<4x256xf32>, i32 -> vector<4x256xf32>
    %c255_i32_19 = arith.constant 255 : i32
    %40 = tpu.dynamic_rotate %33 by %c255_i32_19 dim 1 : vector<4x256xf32>, i32 -> vector<4x256xf32>
    %c241_i32_20 = arith.constant 241 : i32
    %41 = tpu.dynamic_rotate %33 by %c241_i32_20 dim 1 : vector<4x256xf32>, i32 -> vector<4x256xf32>
    %c240_i32_21 = arith.constant 240 : i32
    %42 = tpu.dynamic_rotate %33 by %c240_i32_21 dim 1 : vector<4x256xf32>, i32 -> vector<4x256xf32>
    %c239_i32_22 = arith.constant 239 : i32
    %43 = tpu.dynamic_rotate %33 by %c239_i32_22 dim 1 : vector<4x256xf32>, i32 -> vector<4x256xf32>
    %44 = tpu.concatenate %36, %37, %38, %39, %33, %40, %41, %42, %43 in 0 : vector<4x256xf32>, vector<4x256xf32>, vector<4x256xf32>, vector<4x256xf32>, vector<4x256xf32>, vector<4x256xf32>, vector<4x256xf32>, vector<4x256xf32>, vector<4x256xf32> -> vector<36x256xf32>
    %c0_23 = arith.constant 0 : index
    %c0_24 = arith.constant 0 : index
    %45 = vector.load %arg1[%c0_23, %c0_24] : memref<36x256xf32, #tpu.memory_space<vmem>>, vector<36x256xf32>
    %46 = arith.mulf %44, %45 : vector<36x256xf32>
    %cst_25 = arith.constant dense<0.000000e+00> : vector<4x256xf32>
    %47 = tpu.matmul %35, %46, %cst_25 {dimension_numbers = #tpu.dot_dimension_numbers<[1], [0], [0], [1], [0, 0, 1, 1], [], []>} : vector<4x36xf32>, vector<36x256xf32>, vector<4x256xf32> -> vector<4x256xf32>
    %cst_26 = arith.constant dense<0.000000e+00> : vector<4xf32>
    %48 = vector.multi_reduction <add>, %47, %cst_26 [1] : vector<4x256xf32> to vector<4xf32>
    %49 = vector.shape_cast %48 : vector<4xf32> to vector<4x1xf32>
    %cst_27 = arith.constant 3.906250e-03 : f32
    %50 = vector.broadcast %cst_27 : f32 to vector<4x1xf32>
    %51 = arith.mulf %49, %50 : vector<4x1xf32>
    %52 = vector.broadcast %51 : vector<4x1xf32> to vector<4x256xf32>
    %53 = arith.subf %47, %52 : vector<4x256xf32>
    %54 = arith.mulf %53, %53 : vector<4x256xf32>
    %cst_28 = arith.constant dense<0.000000e+00> : vector<4xf32>
    %55 = vector.multi_reduction <add>, %54, %cst_28 [1] : vector<4x256xf32> to vector<4xf32>
    %56 = vector.shape_cast %55 : vector<4xf32> to vector<4x1xf32>
    %cst_29 = arith.constant 3.906250e-03 : f32
    %57 = vector.broadcast %cst_29 : f32 to vector<4x1xf32>
    %58 = arith.mulf %56, %57 : vector<4x1xf32>
    %cst_30 = arith.constant 9.99999974E-6 : f32
    %59 = vector.broadcast %cst_30 : f32 to vector<4x1xf32>
    %60 = arith.addf %58, %59 : vector<4x1xf32>
    %61 = math.rsqrt %60 : vector<4x1xf32>
    %62 = vector.broadcast %61 : vector<4x1xf32> to vector<4x256xf32>
    %63 = arith.mulf %53, %62 : vector<4x256xf32>
    %64 = arith.addf %1, %63 : vector<4x256xf32>
    %c0_31 = arith.constant 0 : index
    %c0_32 = arith.constant 0 : index
    %c0_33 = arith.constant 0 : index
    %65 = vector.load %arg4[%c0_31, %c0_32, %c0_33] : memref<1x4x256xf32, #tpu.memory_space<vmem>>, vector<1x4x256xf32>
    %66 = vector.shape_cast %65 : vector<1x4x256xf32> to vector<4x256xf32>
    %67 = vector.shape_cast %64 : vector<4x256xf32> to vector<1x4x256xf32>
    tpu.vector_store %arg4[%c0_31, %c0_32, %c0_33], %67 {strides = array<i32>} : memref<1x4x256xf32, #tpu.memory_space<vmem>>, vector<1x4x256xf32>,
    return
  }
  func.func @transform_0(%arg0: i32) -> (i32, i32) {
    %c0_i32 = arith.constant 0 : i32
    %c0_i32_0 = arith.constant 0 : i32
    %c0_i32_1 = arith.constant 0 : i32
    return %c0_i32, %c0_i32_0 : i32, i32
  }
  func.func @transform_1(%arg0: i32) -> (i32, i32, i32) {
    %c0_i32 = arith.constant 0 : i32
    %c0_i32_0 = arith.constant 0 : i32
    %c0_i32_1 = arith.constant 0 : i32
    return %arg0, %c0_i32, %c0_i32_0 : i32, i32, i32
  }
  func.func @transform_2(%arg0: i32) -> (i32, i32, i32) {
    %c0_i32 = arith.constant 0 : i32
    %c0_i32_0 = arith.constant 0 : i32
    %c0_i32_1 = arith.constant 0 : i32
    %c0_i32_2 = arith.constant 0 : i32
    return %c0_i32, %c0_i32_0, %c0_i32_1 : i32, i32, i32
  }
  func.func @transform_3(%arg0: i32) -> (i32, i32, i32) {
    %c0_i32 = arith.constant 0 : i32
    %c0_i32_0 = arith.constant 0 : i32
    %c0_i32_1 = arith.constant 0 : i32
    return %arg0, %c0_i32, %c0_i32_0 : i32, i32, i32
  }
}

</mosaic_0001>

<bundles_post_ra>
// kernel: bloque_residual.1
= control target key start
LH: loop header
LB: loop body
LE: loop exit
PB: predicated region body
PF: predicated region fallthrough
CT: control target
= control target key end

     0   :  { %s738_s12 = smov 0   ;;  %s999_s0 = inlined_call_operand.vmem [shape: f32[36,256], index: 0, kind: input, shape index: {}]   ;;  %s1000_s1 = inlined_call_operand.vmem [shape: f32[2,4,256], index: 1, kind: input, shape index: {}]   ;;  %s1001_s2 = inlined_call_operand.vmem [shape: f32[2,4,36], index: 2, kind: input, shape index: {}]   ;;  %s1002_s3 = inlined_call_operand.vmem [shape: f32[2,4,256], index: 3, kind: output, shape index: {}]  }
   0x1 LB: > { %s643_s13 = sadd.s32 4294967295, %s707_s12   ;;  %p647_p0 = scmp.ge.s32.totalorder %s707_s12, 1  ;;  %s707_s12 = sphi %s738_s12, %s13_s12  }
   0x2   : > { %p137_p1 = scmp.lt.s32.totalorder %s707_s12, 3 }
   0x4   : > { %p138_p2 = pnand %p647_p0, %p137_p1 }
   0x5   : > { %p161_p3 = scmp.lt.s32.totalorder (!%p138_p2), %s643_s13, 1  ;;  %s709_s18 = smov (!%p138_p2), 1   ;;  %v715_v2 = vmov (!%p138_p2), 0.0   ;;  %v180_v3 = vlaneseq (!%p138_p2)  ;;  %vm258_vm3 = vcmask (!%p138_p2), 1043456   ;;  %v813_v19 = vld [vmem:[%s999_s0 + $0x8] sm:$0xff] (!%p138_p2)  ;;  %v819_v25 = vld [vmem:[%s999_s0 + $0x18] sm:$0xff] (!%p138_p2) }
   0x6   : > { %141 = sbr.rel (%p138_p2) target bundleno = 1378 (0x562), region = 32  ;;  %s710_s19 = smov (!%p138_p2), 16   ;;  %361 = vmatprep.mubr.f32.mxu0 (!%p138_p2), %v715_v2  ;;  %555 = vmatprep.mubr.f32.mxu1 (!%p138_p2), %v715_v2  ;;  %v825_v27 = vld [vmem:[%s999_s0] sm:$0xff] (!%p138_p2)  ;;  %v830_v28 = vld [vmem:[%s999_s0 + $0x10] sm:$0xff] (!%p138_p2)  ;;  %v856_v49 = vld [vmem:[%s999_s0 + $0x28] sm:$0xff] (!%p138_p2)  ;;  %vm287_vm9 = vcmask (!%p138_p2), 293888  }
   0x7   : > { %s711_s20 = smov (!%p138_p2), 17   ;;  %s712_s21 = smov (!%p138_p2), 15   ;;  %v792_v6 = vand.u32 (!%p138_p2), 127, %v180_v3  ;;  %v865_v55 = vld [vmem:[%s999_s0 + $0x30] sm:$0xff] (!%p138_p2)  ;;  %v870_v56 = vld [vmem:[%s999_s0 + $0x38] sm:$0xff] (!%p138_p2)  ;;  %v875_v58 = vld [vmem:[%s999_s0 + $0x20] sm:$0xff] (!%p138_p2) }
   0x8   : > { %s713_s22 = smov (!%p138_p2), 127   ;;  %s714_s23 = smov (!%p138_p2), 112   ;;  %v890_v3 = vld [vmem:[%s999_s0 + $0x48] sm:$0xf] (!%p138_p2) }
   0x9   : > { %s716_s24 = smov (!%p138_p2), 113   ;;  %s717_s25 = smov (!%p138_p2), 111   ;;  %vm203_vm0 = vcmp.lt.s32.totalorder (!%p138_p2), %v792_v6, 1  ;;  %vm189_vm1 = vcmp.lt.s32.totalorder (!%p138_p2), %v792_v6, 16  ;;  %vm182_vm2 = vcmp.lt.s32.totalorder (!%p138_p2), %v792_v6, 17  ;;  %vm196_vm4 = vcmp.lt.s32.totalorder (!%p138_p2), %v792_v6, 15 }
   0xa   : > { %vm210_vm5 = vcmp.lt.s32.totalorder (!%p138_p2), %v792_v6, 127  ;;  %vm224_vm6 = vcmp.lt.s32.totalorder (!%p138_p2), %v792_v6, 112  ;;  %vm217_vm7 = vcmp.lt.s32.totalorder (!%p138_p2), %v792_v6, 113  ;;  %vm231_vm8 = vcmp.lt.s32.totalorder (!%p138_p2), %v792_v6, 111 }
   0xd   : > { %s1004_s13 = smov (!%p161_p3, %s643_s13), 1 }
   0xe   : > { %s661_s14 = sshll.u32 %s1004_s13, 3 }
   0xf   : > { %s165_s17 = scalar_lea.vmem %s1000_s1, %s661_s14 }
  0x10   : > { %v754_v0 = vld [vmem:[%s165_s17] sm:$0xff] }
  0x11   : > { %199 = vrot.lane.b32.xlu1 %v754_v0, %s709_s18  ;;  %185 = vrot.lane.b32.xlu0 %v754_v0, %s710_s19  ;;  %v762_v1 = vcombine.high %v754_v0, %v754_v0 }
  0x15   : > { %176 = vrot.lane.b32.xlu0 %v754_v0, %s711_s20  ;;  %201 = vrot.lane.b32.xlu1 %v762_v1, %s709_s18 }
  0x19   : > { %178 = vrot.lane.b32.xlu1 %v762_v1, %s711_s20  ;;  %187 = vrot.lane.b32.xlu0 %v762_v1, %s710_s19 }
  0x1d   : > { %194 = vrot.lane.b32.xlu1 %v762_v1, %s712_s21  ;;  %192 = vrot.lane.b32.xlu0 %v754_v0, %s712_s21 }
  0x21   : > { %208 = vrot.lane.b32.xlu1 %v762_v1, %s713_s22  ;;  %206 = vrot.lane.b32.xlu0 %v754_v0, %s713_s22 }
  0x25   : > { %222 = vrot.lane.b32.xlu1 %v762_v1, %s714_s23  ;;  %220 = vrot.lane.b32.xlu0 %v754_v0, %s714_s23 }
  0x29   : > { %215 = vrot.lane.b32.xlu1 %v762_v1, %s716_s24  ;;  %213 = vrot.lane.b32.xlu0 %v754_v0, %s716_s24 }
  0x2d   : > { %229 = vrot.lane.b32.xlu1 %v762_v1, %s717_s25  ;;  %227 = vrot.lane.b32.xlu0 %v754_v0, %s717_s25 }
  0x83   : > { %v200_v4 = vpop.permute.xlu1 %199  ;;  %v186_v5 = vpop.permute.xlu0 %185 }
  0x87   : > { %v177_v7 = vpop.permute.xlu0 %176  ;;  %v202_v8 = vpop.permute.xlu1 %201 }
  0x88   : > { %v204_v11 = vsel %vm203_vm0, %v200_v4, %v202_v8  ;;  %v205_v12 = vsel %vm203_vm0, %v202_v8, %v200_v4 }
  0x89   : > { %v242_v20 = vrot.slane %v205_v12, 4  ;;  %v243_v21 = vrot.slane %v204_v11, 4 }
  0x8b   : > { %v179_v9 = vpop.permute.xlu1 %178  ;;  %v188_v10 = vpop.permute.xlu0 %187 }
  0x8c   : > { %v190_v13 = vsel %vm189_vm1, %v186_v5, %v188_v10  ;;  %v191_v14 = vsel %vm189_vm1, %v188_v10, %v186_v5  ;;  %v183_v17 = vsel %vm182_vm2, %v177_v7, %v179_v9  ;;  %v184_v18 = vsel %vm182_vm2, %v179_v9, %v177_v7  ;;  %v896_v9 = vld [vmem:[%s999_s0 + $0x40] sm:$0xf] }
  0x8d   : > { %v236_v15 = vrot.slane %v191_v14, 4  ;;  %v237_v16 = vrot.slane %v190_v13, 4 }
  0x8f   : > { %v195_v22 = vpop.permute.xlu1 %194  ;;  %v193_v23 = vpop.permute.xlu0 %192  ;;  %v260_v24 = vsel %vm258_vm3, %v183_v17, %v237_v16  ;;  %v259_v26 = vsel %vm258_vm3, %v184_v18, %v236_v15  ;;  %v172_v15 = vld [vmem:[%s1001_s2] sm:$0xf] }
  0x90   : > { %v197_v29 = vsel %vm196_vm4, %v193_v23, %v195_v22  ;;  %v198_v30 = vsel %vm196_vm4, %v195_v22, %v193_v23  ;;  %v278_v33 = vmul.f32 %v813_v19, %v260_v24  ;;  %v277_v35 = vmul.f32 %v825_v27, %v259_v26 }
  0x91   : > { %v261_v31 = vsel %vm258_vm3, %v198_v30, %v242_v20  ;;  %v262_v32 = vsel %vm258_vm3, %v197_v29, %v243_v21 }
  0x92   : > { %v280_v34 = vmul.f32 %v819_v25, %v262_v32  ;;  %v279_v36 = vmul.f32 %v830_v28, %v261_v31 }
  0x93   : > { %v209_v37 = vpop.permute.xlu1 %208  ;;  %v207_v38 = vpop.permute.xlu0 %206 }
  0x94   : > { %v211_v39 = vsel %vm210_vm5, %v207_v38, %v209_v37  ;;  %v212_v40 = vsel %vm210_vm5, %v209_v37, %v207_v38  ;;  %v663_v41 = vpack.c.bf16 %v280_v34, %v278_v33  ;;  %v665_v42 = vpack.c.bf16 %v279_v36, %v277_v35 }
  0x95   : > { %v248_v43 = vrot.slane %v211_v39, 4  ;;  %v249_v44 = vrot.slane %v212_v40, 4 }
  0x96   : > { %664 = vmatprep.subr.bf16.mxu0 %v663_v41 }
  0x97   : > { %v223_v45 = vpop.permute.xlu1 %222  ;;  %666 = vmatpush1.bf16.msra.mxu0 %v665_v42  ;;  %v221_v46 = vpop.permute.xlu0 %220  ;;  %v263_v50 = vsel %vm258_vm3, %v754_v0, %v248_v43  ;;  %v264_v51 = vsel %vm258_vm3, %v762_v1, %v249_v44 }
  0x98   : > { %v225_v47 = vsel %vm224_vm6, %v221_v46, %v223_v45  ;;  %v226_v48 = vsel %vm224_vm6, %v223_v45, %v221_v46  ;;  %v282_v2 = vmul.f32 %v856_v49, %v264_v51  ;;  %v281_v4 = vmul.f32 %v875_v58, %v263_v50 }
  0x99   : > { %v254_v52 = vrot.slane %v225_v47, 4  ;;  %v255_v53 = vrot.slane %v226_v48, 4 }
  0x9b   : > { %v216_v54 = vpop.permute.xlu1 %215  ;;  %v214_v57 = vpop.permute.xlu0 %213 }
  0x9c   : > { %v218_v59 = vsel %vm217_vm7, %v214_v57, %v216_v54  ;;  %v219_v60 = vsel %vm217_vm7, %v216_v54, %v214_v57 }
  0x9d   : > { %v265_v61 = vsel %vm258_vm3, %v218_v59, %v254_v52  ;;  %v266_v62 = vsel %vm258_vm3, %v219_v60, %v255_v53 }
  0x9e   : > { %v283_v63 = vmul.f32 %v865_v55, %v265_v61  ;;  %v284_v1 = vmul.f32 %v870_v56, %v266_v62 }
  0x9f   : > { %v230_v5 = vpop.permute.xlu1 %229  ;;  %v228_v7 = vpop.permute.xlu0 %227 }
  0xa0   : > { %v667_v8 = vpack.c.bf16 %v284_v1, %v282_v2  ;;  %v232_v10 = vsel %vm231_vm8, %v228_v7, %v230_v5  ;;  %v233_v11 = vsel %vm231_vm8, %v230_v5, %v228_v7  ;;  %v669_v12 = vpack.c.bf16 %v283_v63, %v281_v4 }
  0xa1   : > { %v286_v13 = vmul.f32 %v890_v3, %v233_v11  ;;  %v285_v14 = vmul.f32 %v896_v9, %v232_v10 }
  0xa2   : > { %668 = vmatprep.subr.bf16.mxu0 %v667_v8 }
  0xa3   : > { %670 = vmatpush1.bf16.msra.mxu0 %v669_v12 }
  0xa4   : > { %652 = vmatprep.subr.msk.mxu0 %vm258_vm3, %v286_v13 }
  0xa7   : > { %653 = vmatpush1.msk.msra.mxu0 %vm258_vm3, %v285_v14 }
  0xa8   : > { %654 = vmatmul.mubr.msk.f32.vlgmr.msra.gmra.mrb[0].mxu0 %vm287_vm9, %v172_v15 }
 0x17b   : > { %v363_v16 = vpop.f32.mrb[0].mxu0 }
 0x17c   : > { %v368_v17 = vsel %vm258_vm3, %v363_v16, 0.0  ;;  %v365_v18 = vpop.f32.mrb[1].mxu0 }
 0x17d   : > { %v369_v20 = vsel %vm258_vm3, %v365_v18, 0.0 }
 0x17e   : > { %v370_v21 = vadd.f32 %v369_v20, %v368_v17 }
 0x180   : > { %371 = vadd.xlane.f32.xlu0 %v370_v21 }
 0x20d   : > { %v372_v22 = vpop.xlane.xlu0 %371 }
 0x20e   : > { %v373_v23 = vmul.f32 0.00390625, %v372_v22 }
 0x210   : > { %v374_v24 = vsub.f32 %v363_v16, %v373_v23  ;;  %v375_v26 = vsub.f32 %v365_v18, %v373_v23 }
 0x212   : > { %v376_v29 = vmul.f32 %v374_v24, %v374_v24  ;;  %v377_v30 = vmul.f32 %v375_v26, %v375_v26 }
 0x214   : > { %v378_v31 = vsel %vm258_vm3, %v376_v29, 0.0  ;;  %v379_v32 = vsel %vm258_vm3, %v377_v30, 0.0 }
 0x215   : > { %v380_v33 = vadd.f32 %v379_v32, %v378_v31 }
 0x217   : > { %381 = vadd.xlane.f32.xlu1 %v380_v33 }
 0x2a4   : > { %v382_v34 = vpop.xlane.xlu1 %381 }
 0x2a5   : > { %v383_v35 = vmul.f32 0.00390625, %v382_v34 }
 0x2a7   : > { %v384_v36 = vadd.f32 1e-05, %v383_v35 }
 0x2a9   : > { %697 = vrsqrt.f32 %v384_v36 }
 0x2b3   : > { %v698_v37 = vpop.eup %697 }
 0x2b4   : > { %v386_v38 = vmul.f32 %v698_v37, %v374_v24  ;;  %v387_v39 = vmul.f32 %v698_v37, %v375_v26 }
 0x2b6   : > { %v388_v40 = vmax.f32 %v386_v38, 0.0  ;;  %v389_v41 = vmax.f32 %v387_v39, 0.0 }
 0x2b8   : > { %400 = vrot.lane.b32.xlu1 %v389_v41, %s710_s19  ;;  %398 = vrot.lane.b32.xlu0 %v388_v40, %s710_s19 }
 0x2bc   : > { %412 = vrot.lane.b32.xlu1 %v389_v41, %s709_s18  ;;  %410 = vrot.lane.b32.xlu0 %v388_v40, %s709_s18 }
 0x2c0   : > { %394 = vrot.lane.b32.xlu1 %v389_v41, %s711_s20  ;;  %392 = vrot.lane.b32.xlu0 %v388_v40, %s711_s20 }
 0x2c4   : > { %406 = vrot.lane.b32.xlu1 %v389_v41, %s712_s21  ;;  %404 = vrot.lane.b32.xlu0 %v388_v40, %s712_s21 }
 0x2c8   : > { %418 = vrot.lane.b32.xlu1 %v389_v41, %s713_s22  ;;  %416 = vrot.lane.b32.xlu0 %v388_v40, %s713_s22  ;;  %s170_s22 = scalar_lea.vmem %s1002_s3, %s661_s14 }
 0x2cc   : > { %430 = vrot.lane.b32.xlu1 %v389_v41, %s714_s23  ;;  %428 = vrot.lane.b32.xlu0 %v388_v40, %s714_s23 }
 0x2d0   : > { %424 = vrot.lane.b32.xlu1 %v389_v41, %s716_s24  ;;  %422 = vrot.lane.b32.xlu0 %v388_v40, %s716_s24 }
 0x2d4   : > { %436 = vrot.lane.b32.xlu1 %v389_v41, %s717_s25  ;;  %434 = vrot.lane.b32.xlu0 %v388_v40, %s717_s25 }
 0x32a   : > { %v401_v42 = vpop.permute.xlu1 %400  ;;  %v399_v43 = vpop.permute.xlu0 %398 }
 0x32b   : > { %v402_v46 = vsel %vm189_vm1, %v399_v43, %v401_v42  ;;  %v403_v47 = vsel %vm189_vm1, %v401_v42, %v399_v43 }
 0x32c   : > { %v442_v57 = vrot.slane %v403_v47, 4  ;;  %v443_v59 = vrot.slane %v402_v46, 4 }
 0x32e   : > { %v413_v44 = vpop.permute.xlu1 %412  ;;  %v411_v45 = vpop.permute.xlu0 %410 }
 0x32f   : > { %v414_v51 = vsel %vm203_vm0, %v411_v45, %v413_v44  ;;  %v415_v52 = vsel %vm203_vm0, %v413_v44, %v411_v45 }
 0x330   : > { %v448_v60 = vrot.slane %v415_v52, 4  ;;  %v449_v61 = vrot.slane %v414_v51, 4 }
 0x332   : > { %v395_v48 = vpop.permute.xlu1 %394  ;;  %v393_v50 = vpop.permute.xlu0 %392 }
 0x333   : > { %v396_v53 = vsel %vm182_vm2, %v393_v50, %v395_v48  ;;  %v397_v54 = vsel %vm182_vm2, %v395_v48, %v393_v50 }
 0x334   : > { %v464_v62 = vsel %vm258_vm3, %v397_v54, %v442_v57  ;;  %v465_v2 = vsel %vm258_vm3, %v396_v53, %v443_v59 }
 0x335   : > { %v473_v10 = vmul.f32 %v465_v2, %v813_v19  ;;  %v472_v12 = vmul.f32 %v464_v62, %v825_v27 }
 0x336   : > { %v407_v63 = vpop.permute.xlu1 %406  ;;  %v405_v1 = vpop.permute.xlu0 %404 }
 0x337   : > { %v408_v4 = vsel %vm196_vm4, %v405_v1, %v407_v63  ;;  %v409_v5 = vsel %vm196_vm4, %v407_v63, %v405_v1 }
 0x338   : > { %v466_v7 = vsel %vm258_vm3, %v409_v5, %v448_v60  ;;  %v467_v8 = vsel %vm258_vm3, %v408_v4, %v449_v61 }
 0x339   : > { %v475_v11 = vmul.f32 %v467_v8, %v819_v25  ;;  %v474_v13 = vmul.f32 %v466_v7, %v830_v28 }
 0x33a   : > { %v419_v14 = vpop.permute.xlu1 %418  ;;  %v417_v15 = vpop.permute.xlu0 %416 }
 0x33b   : > { %v420_v16 = vsel %vm210_vm5, %v417_v15, %v419_v14  ;;  %v421_v17 = vsel %vm210_vm5, %v419_v14, %v417_v15  ;;  %v671_v18 = vpack.c.bf16 %v475_v11, %v473_v10  ;;  %v673_v20 = vpack.c.bf16 %v474_v13, %v472_v12 }
 0x33c   : > { %v454_v21 = vrot.slane %v420_v16, 4  ;;  %v455_v22 = vrot.slane %v421_v17, 4 }
 0x33d   : > { %672 = vmatprep.subr.bf16.mxu1 %v671_v18 }
 0x33e   : > { %v431_v19 = vpop.permute.xlu1 %430  ;;  %674 = vmatpush1.bf16.msra.mxu1 %v673_v20  ;;  %v429_v25 = vpop.permute.xlu0 %428  ;;  %v468_v23 = vsel %vm258_vm3, %v388_v40, %v454_v21  ;;  %v469_v24 = vsel %vm258_vm3, %v389_v41, %v455_v22 }
 0x33f   : > { %v432_v27 = vsel %vm224_vm6, %v429_v25, %v431_v19  ;;  %v433_v28 = vsel %vm224_vm6, %v431_v19, %v429_v25  ;;  %v477_v38 = vmul.f32 %v469_v24, %v856_v49  ;;  %v476_v39 = vmul.f32 %v468_v23, %v875_v58 }
 0x340   : > { %v460_v26 = vrot.slane %v432_v27, 4  ;;  %v461_v29 = vrot.slane %v433_v28, 4 }
 0x342   : > { %v425_v30 = vpop.permute.xlu1 %424  ;;  %v423_v31 = vpop.permute.xlu0 %422 }
 0x343   : > { %v426_v32 = vsel %vm217_vm7, %v423_v31, %v425_v30  ;;  %v427_v33 = vsel %vm217_vm7, %v425_v30, %v423_v31 }
 0x344   : > { %v470_v34 = vsel %vm258_vm3, %v426_v32, %v460_v26  ;;  %v471_v35 = vsel %vm258_vm3, %v427_v33, %v461_v29 }
 0x345   : > { %v478_v36 = vmul.f32 %v470_v34, %v865_v55  ;;  %v479_v37 = vmul.f32 %v471_v35, %v870_v56  ;;  %v655_v55 = vld [vmem:[%s1001_s2 + $0x4] sm:$0xf] }
 0x346   : > { %v437_v40 = vpop.permute.xlu1 %436  ;;  %v435_v41 = vpop.permute.xlu0 %434 }
 0x347   : > { %v439_v42 = vsel %vm231_vm8, %v437_v40, %v435_v41  ;;  %v675_v43 = vpack.c.bf16 %v479_v37, %v477_v38  ;;  %v677_v44 = vpack.c.bf16 %v478_v36, %v476_v39  ;;  %v438_v46 = vsel %vm231_vm8, %v435_v41, %v437_v40 }
 0x348   : > { %v481_v45 = vmul.f32 %v439_v42, %v890_v3  ;;  %v480_v49 = vmul.f32 %v438_v46, %v896_v9 }
 0x349   : > { %676 = vmatprep.subr.bf16.mxu1 %v675_v43 }
 0x34a   : > { %678 = vmatpush1.bf16.msra.mxu1 %v677_v44 }
 0x34b   : > { %656 = vmatprep.subr.msk.mxu1 %vm258_vm3, %v481_v45 }
 0x34e   : > { %657 = vmatpush1.msk.msra.mxu1 %vm258_vm3, %v480_v49 }
 0x34f   : > { %658 = vmatmul.mubr.msk.f32.vlgmr.msra.gmra.mrb[0].mxu1 %vm287_vm9, %v655_v55 }
 0x422   : > { %v557_v56 = vpop.f32.mrb[0].mxu1 }
 0x423   : > { %v562_v58 = vsel %vm258_vm3, %v557_v56, 0.0  ;;  %v559_v3 = vpop.f32.mrb[1].mxu1 }
 0x424   : > { %v563_v6 = vsel %vm258_vm3, %v559_v3, 0.0 }
 0x425   : > { %v564_v47 = vadd.f32 %v563_v6, %v562_v58 }
 0x427   : > { %565 = vadd.xlane.f32.xlu0 %v564_v47 }
 0x4b4   : > { %v566_v48 = vpop.xlane.xlu0 %565 }
 0x4b5   : > { %v567_v50 = vmul.f32 0.00390625, %v566_v48 }
 0x4b7   : > { %v568_v51 = vsub.f32 %v557_v56, %v567_v50  ;;  %v569_v9 = vsub.f32 %v559_v3, %v567_v50 }
 0x4b9   : > { %v570_v52 = vmul.f32 %v568_v51, %v568_v51  ;;  %v571_v53 = vmul.f32 %v569_v9, %v569_v9 }
 0x4bb   : > { %v572_v54 = vsel %vm258_vm3, %v570_v52, 0.0  ;;  %v573_v57 = vsel %vm258_vm3, %v571_v53, 0.0 }
 0x4bc   : > { %v574_v59 = vadd.f32 %v573_v57, %v572_v54 }
 0x4be   : > { %575 = vadd.xlane.f32.xlu1 %v574_v59 }
 0x54b   : > { %v576_v60 = vpop.xlane.xlu1 %575 }
 0x54c   : > { %v577_v61 = vmul.f32 0.00390625, %v576_v60 }
 0x54e   : > { %v578_v62 = vadd.f32 1e-05, %v577_v61 }
 0x550   : > { %699 = vrsqrt.f32 %v578_v62 }
 0x55a   : > { %v700_v63 = vpop.eup %699 }
 0x55b   : > { %v580_v1 = vmul.f32 %v700_v63, %v568_v51  ;;  %v581_v2 = vmul.f32 %v700_v63, %v569_v9 }
 0x55d   : > { %v584_v4 = vcombine.low %v580_v1, %v581_v2 }
 0x55f   : > { %v586_v5 = vadd.f32 %v584_v4, %v754_v0 }
 0x561   : > { %587 = vst [vmem:[%s170_s22] sm:$0xff] %v586_v5 }
 0x562 PF: > { %s13_s12 = sadd.s32 1, %s707_s12  }
 0x563   : > { %p10_p4 = scmp.ge.s32.totalorder %s13_s12, 4  }
 0x565   :  { %12 = sbr.rel (!%p10_p4) target bundleno = 1 (0x1), region = 63 }

</bundles_post_ra>
